<compile_context>
chip_gen: v7x
topology: tpu7x:2x2x1
jax: 0.10.0
libtpu: 0.0.40
codegen_flags: <defaults>
</compile_context>

<pallas_src>
import functools

import jax
import jax.numpy as jnp
from jax.experimental import pallas as pl
from jax.experimental.pallas import tpu as pltpu


# ----------------------------------------------------------------------------
# Kernel: fused (Linear -> ReLU) x N  +  final Linear, all in one invocation.
# refs layout: (x_ref, w0, b0, w1, b1, ..., w_last, b_last, o_ref)
# Weights are already (IN, OUT) bf16; biases are (1, OUT) f32.
# ----------------------------------------------------------------------------
def _fused_mlp_kernel(*refs, n_layers: int):
    x_ref = refs[0]
    o_ref = refs[-1]
    param_refs = refs[1:-1]

    h = x_ref[...]                                  # (B, IN) f32
    for l in range(n_layers):                       # static unrolled layer loop
        w = param_refs[2 * l][...]                  # (in, out) bf16
        b = param_refs[2 * l + 1][...]              # (1, out)  f32
        # bf16 only on the MXU operands; accumulate + bias + ReLU in f32.
        h = jnp.dot(h.astype(w.dtype), w,
                    preferred_element_type=jnp.float32) + b
        if l < n_layers - 1:                        # ReLU on hidden layers only
            h = jnp.maximum(h, 0.0)
    o_ref[...] = h.astype(o_ref.dtype)


# ----------------------------------------------------------------------------
# One-time parameter preparation: transpose to (IN, OUT), cast weights to bf16.
# No padding (full-array blocks inside the kernel, Mosaic masks the tails).
# ----------------------------------------------------------------------------
def prepare_params(hidden_params, output_params, mxu_dtype=jnp.bfloat16):
    layers = list(hidden_params) + [output_params]
    prepped = []
    for (w, b) in layers:                           # w: (OUT, IN) PyTorch layout
        w_t = jnp.asarray(w, jnp.float32).T.astype(mxu_dtype)   # (IN, OUT) bf16
        b_r = jnp.asarray(b, jnp.float32).reshape(1, -1)        # (1, OUT)  f32
        prepped.append((w_t, b_r))
    return prepped


# ----------------------------------------------------------------------------
# Forward: single fused pallas_call, no host-side pad / slice ops.
# ----------------------------------------------------------------------------
def neural_network_forward(x, prepped_params):
    B = x.shape[0]
    OUT = prepped_params[-1][0].shape[1]
    n_layers = len(prepped_params)

    flat_params = []
    flops = 0
    bytes_accessed = x.size * x.dtype.itemsize + B * OUT * x.dtype.itemsize
    resident_bytes = x.size * x.dtype.itemsize + B * OUT * x.dtype.itemsize
    for (w, b) in prepped_params:
        flat_params += [w, b]
        flops += 2 * B * w.shape[0] * w.shape[1]
        nbytes = w.size * w.dtype.itemsize + b.size * b.dtype.itemsize
        bytes_accessed += nbytes
        resident_bytes += nbytes

    # Generous headroom, but clamped to a value that is valid on every chip
    # generation (v7x has only 64 MiB physical VMEM per TensorCore).
    vmem_limit = min(max(8 * resident_bytes, 4 * 1024 * 1024), 32 * 1024 * 1024)

    kernel = functools.partial(_fused_mlp_kernel, n_layers=n_layers)
    return pl.pallas_call(
        kernel,
        out_shape=jax.ShapeDtypeStruct((B, OUT), x.dtype),
        compiler_params=pltpu.CompilerParams(vmem_limit_bytes=vmem_limit),
        cost_estimate=pl.CostEstimate(
            flops=flops, transcendentals=0, bytes_accessed=bytes_accessed),
    )(x, *flat_params)


# ----------------------------------------------------------------------------
# Deterministic PyTorch-style (uniform +/- 1/sqrt(fan_in)) initialization.
# Weights kept in PyTorch (OUT, IN) layout here; prepare_params() transposes
# and casts once.
# ----------------------------------------------------------------------------
def init_params(key, input_size, hidden_size, output_size, n_hidden_layers):
    hidden_params = []
    for i in range(n_hidden_layers):
        fan_in = input_size if i == 0 else hidden_size
        key, kw, kb = jax.random.split(key, 3)
        bound = 1.0 / jnp.sqrt(jnp.float32(fan_in))
        w = jax.random.uniform(kw, (hidden_size, fan_in), jnp.float32,
                               minval=-bound, maxval=bound)
        b = jax.random.uniform(kb, (hidden_size,), jnp.float32,
                               minval=-bound, maxval=bound)
        hidden_params.append((w, b))
    key, kw, kb = jax.random.split(key, 3)
    bound = 1.0 / jnp.sqrt(jnp.float32(hidden_size))
    w_out = jax.random.uniform(kw, (output_size, hidden_size), jnp.float32,
                               minval=-bound, maxval=bound)
    b_out = jax.random.uniform(kb, (output_size,), jnp.float32,
                               minval=-bound, maxval=bound)
    return hidden_params, (w_out, b_out)


if __name__ == "__main__":
    # Small shapes consistent with the module's forward.
    batch = 2
    input_size = 16
    hidden_size = 32
    output_size = 8
    n_hidden_layers = 3

    key = jax.random.PRNGKey(0)
    key, kx = jax.random.split(key)
    x = jax.random.normal(kx, (batch, input_size), jnp.float32)

    hidden_params, output_params = init_params(
        key, input_size, hidden_size, output_size, n_hidden_layers)

    # One-time weight transpose + bf16 cast (outside the hot path).
    prepped_params = prepare_params(hidden_params, output_params)

    out = neural_network_forward(x, prepped_params)
    out = jax.block_until_ready(out)

    # Pure-JAX f32 reference of the same math (original PyTorch layout).
    # Tolerance accounts for the intentional bf16 cast on MXU operands.
    ref = x
    for (w, b) in hidden_params:
        ref = jnp.maximum(ref @ w.T + b, 0.0)
    w_out, b_out = output_params
    ref = ref @ w_out.T + b_out

    assert out.shape == (batch, output_size)
    assert jnp.allclose(out, ref, atol=2e-2, rtol=2e-2), (
        f"max abs err {jnp.max(jnp.abs(out - ref))}")

    print("KERNEL_OK")
</pallas_src>

<mosaic_0001>
module attributes {stable_mosaic.version = 11 : i64} {
  func.func @_fused_mlp_kernel(%arg0: memref<2x16xf32, #tpu.memory_space<vmem>>, %arg1: memref<16x32xbf16, #tpu.memory_space<vmem>>, %arg2: memref<1x32xf32, #tpu.memory_space<vmem>>, %arg3: memref<32x32xbf16, #tpu.memory_space<vmem>>, %arg4: memref<1x32xf32, #tpu.memory_space<vmem>>, %arg5: memref<32x32xbf16, #tpu.memory_space<vmem>>, %arg6: memref<1x32xf32, #tpu.memory_space<vmem>>, %arg7: memref<32x8xbf16, #tpu.memory_space<vmem>>, %arg8: memref<1x8xf32, #tpu.memory_space<vmem>>, %arg9: memref<2x8xf32, #tpu.memory_space<vmem>>) attributes {dimension_semantics = [], scalar_prefetch = 0 : i64, scratch_operands = 0 : i64, tpu.core_type = #tpu.core_type<tc>} {
    %c0 = arith.constant 0 : index
    %c0_0 = arith.constant 0 : index
    %0 = vector.load %arg0[%c0, %c0_0] : memref<2x16xf32, #tpu.memory_space<vmem>>, vector<2x16xf32>
    %c0_1 = arith.constant 0 : index
    %c0_2 = arith.constant 0 : index
    %1 = vector.load %arg1[%c0_1, %c0_2] : memref<16x32xbf16, #tpu.memory_space<vmem>>, vector<16x32xbf16>
    %c0_3 = arith.constant 0 : index
    %c0_4 = arith.constant 0 : index
    %2 = vector.load %arg2[%c0_3, %c0_4] : memref<1x32xf32, #tpu.memory_space<vmem>>, vector<1x32xf32>
    %3 = arith.truncf %0 : vector<2x16xf32> to vector<2x16xbf16>
    %cst = arith.constant dense<0.000000e+00> : vector<2x32xf32>
    %4 = tpu.matmul %3, %1, %cst {dimension_numbers = #tpu.dot_dimension_numbers<[1], [0], [0], [1], [0, 0, 1, 1], [], []>} : vector<2x16xbf16>, vector<16x32xbf16>, vector<2x32xf32> -> vector<2x32xf32>
    %5 = vector.broadcast %2 : vector<1x32xf32> to vector<2x32xf32>
    %6 = arith.addf %4, %5 : vector<2x32xf32>
    %cst_5 = arith.constant 0.000000e+00 : f32
    %7 = vector.broadcast %cst_5 : f32 to vector<2x32xf32>
    %8 = arith.maximumf %6, %7 : vector<2x32xf32>
    %c0_6 = arith.constant 0 : index
    %c0_7 = arith.constant 0 : index
    %9 = vector.load %arg3[%c0_6, %c0_7] : memref<32x32xbf16, #tpu.memory_space<vmem>>, vector<32x32xbf16>
    %c0_8 = arith.constant 0 : index
    %c0_9 = arith.constant 0 : index
    %10 = vector.load %arg4[%c0_8, %c0_9] : memref<1x32xf32, #tpu.memory_space<vmem>>, vector<1x32xf32>
    %11 = arith.truncf %8 : vector<2x32xf32> to vector<2x32xbf16>
    %cst_10 = arith.constant dense<0.000000e+00> : vector<2x32xf32>
    %12 = tpu.matmul %11, %9, %cst_10 {dimension_numbers = #tpu.dot_dimension_numbers<[1], [0], [0], [1], [0, 0, 1, 1], [], []>} : vector<2x32xbf16>, vector<32x32xbf16>, vector<2x32xf32> -> vector<2x32xf32>
    %13 = vector.broadcast %10 : vector<1x32xf32> to vector<2x32xf32>
    %14 = arith.addf %12, %13 : vector<2x32xf32>
    %cst_11 = arith.constant 0.000000e+00 : f32
    %15 = vector.broadcast %cst_11 : f32 to vector<2x32xf32>
    %16 = arith.maximumf %14, %15 : vector<2x32xf32>
    %c0_12 = arith.constant 0 : index
    %c0_13 = arith.constant 0 : index
    %17 = vector.load %arg5[%c0_12, %c0_13] : memref<32x32xbf16, #tpu.memory_space<vmem>>, vector<32x32xbf16>
    %c0_14 = arith.constant 0 : index
    %c0_15 = arith.constant 0 : index
    %18 = vector.load %arg6[%c0_14, %c0_15] : memref<1x32xf32, #tpu.memory_space<vmem>>, vector<1x32xf32>
    %19 = arith.truncf %16 : vector<2x32xf32> to vector<2x32xbf16>
    %cst_16 = arith.constant dense<0.000000e+00> : vector<2x32xf32>
    %20 = tpu.matmul %19, %17, %cst_16 {dimension_numbers = #tpu.dot_dimension_numbers<[1], [0], [0], [1], [0, 0, 1, 1], [], []>} : vector<2x32xbf16>, vector<32x32xbf16>, vector<2x32xf32> -> vector<2x32xf32>
    %21 = vector.broadcast %18 : vector<1x32xf32> to vector<2x32xf32>
    %22 = arith.addf %20, %21 : vector<2x32xf32>
    %cst_17 = arith.constant 0.000000e+00 : f32
    %23 = vector.broadcast %cst_17 : f32 to vector<2x32xf32>
    %24 = arith.maximumf %22, %23 : vector<2x32xf32>
    %c0_18 = arith.constant 0 : index
    %c0_19 = arith.constant 0 : index
    %25 = vector.load %arg7[%c0_18, %c0_19] : memref<32x8xbf16, #tpu.memory_space<vmem>>, vector<32x8xbf16>
    %c0_20 = arith.constant 0 : index
    %c0_21 = arith.constant 0 : index
    %26 = vector.load %arg8[%c0_20, %c0_21] : memref<1x8xf32, #tpu.memory_space<vmem>>, vector<1x8xf32>
    %27 = arith.truncf %24 : vector<2x32xf32> to vector<2x32xbf16>
    %cst_22 = arith.constant dense<0.000000e+00> : vector<2x8xf32>
    %28 = tpu.matmul %27, %25, %cst_22 {dimension_numbers = #tpu.dot_dimension_numbers<[1], [0], [0], [1], [0, 0, 1, 1], [], []>} : vector<2x32xbf16>, vector<32x8xbf16>, vector<2x8xf32> -> vector<2x8xf32>
    %29 = vector.broadcast %26 : vector<1x8xf32> to vector<2x8xf32>
    %30 = arith.addf %28, %29 : vector<2x8xf32>
    %c0_23 = arith.constant 0 : index
    %c0_24 = arith.constant 0 : index
    %31 = vector.load %arg9[%c0_23, %c0_24] : memref<2x8xf32, #tpu.memory_space<vmem>>, vector<2x8xf32>
    tpu.vector_store %arg9[%c0_23, %c0_24], %30 {strides = array<i32>} : memref<2x8xf32, #tpu.memory_space<vmem>>, vector<2x8xf32>,
    return
  }
}

</mosaic_0001>

<bundles_post_ra>
// kernel: tpu_custom_call.1
= control target key start
LH: loop header
LB: loop body
LE: loop exit
PB: predicated region body
PF: predicated region fallthrough
CT: control target
= control target key end

     0   :  { %14 = vsyncpa [#allocation3], 0  ;;  %s667_s0 = inlined_call_operand.vmem [shape: f32[2,16], index: 0, kind: input, shape index: {}]   ;;  %s668_s1 = inlined_call_operand.hbm [shape: bf16[16,32], index: 1, kind: input, shape index: {}]   ;;  %s669_s2 = inlined_call_operand.hbm [shape: f32[1,32], index: 2, kind: input, shape index: {}]   ;;  %s670_s3 = inlined_call_operand.vmem [shape: bf16[32,32], index: 3, kind: input, shape index: {}]   ;;  %s671_s4 = inlined_call_operand.hbm [shape: f32[1,32], index: 4, kind: input, shape index: {}]   ;;  %s672_s5 = inlined_call_operand.vmem [shape: bf16[32,32], index: 5, kind: input, shape index: {}]   ;;  %s673_s6 = inlined_call_operand.vmem [shape: f32[1,32], index: 6, kind: input, shape index: {}]   ;;  %s674_s7 = inlined_call_operand.vmem [shape: bf16[32,8], index: 7, kind: input, shape index: {}]   ;;  %s675_s8 = inlined_call_operand.vmem [shape: f32[1,8], index: 8, kind: input, shape index: {}]   ;;  %s676_s9 = inlined_call_operand.hbm [shape: f32[2,8], index: 9, kind: output, shape index: {}]  }
   0x1   :  { %15 = vsyncpa [#allocation6], 0 }
   0x2   :  { %16 = vsyncpa [#allocation4], 0  ;;  %s520_s30 = smov [#allocation5]   ;;  %s521_s11 = smov [#allocation2]  }
   0x3   :  { %s37_s10 = sshll.u32 %s520_s30, 4  ;;  %s24_s12 = sshll.u32 %s521_s11, 4  ;;  %s38_s10 = int_to_ptr.vmem [resolvable:$true] %s37_s10  ;;  %s578_s12 = int_to_ptr.vmem [resolvable:$true] %s24_s12 }
   0x4   :  { %s426_s15 = scalar_lea.hbm %s669_s2, 16 }
   0x5   :  { %p427_p0 = scmp.ne.s32.totalorder %s669_s2, %s426_s15  ;;  %p430_p1 = scmp.lt.u32.totalorder %s426_s15, %s669_s2 }
   0x7   :  { %p432_p2 = pnand %p430_p1, %p427_p0 }
   0x9   :  { %435 = shalt.err (!%p432_p2)
}
   0xa   :  { %s436_s20 = scalar_lea.vmem %s38_s10, 16  ;;  %s440_s21 = scalar_lea.vmem %s38_s10, 32 }
   0xb   :  { %p437_p3 = scmp.ne.s32.totalorder %s38_s10, %s436_s20  ;;  %p441_p4 = scmp.lt.s32.totalorder %s38_s10, %s38_s10 }
   0xc   :  { %p442_p5 = scmp.lt.s32.totalorder %s440_s21, %s436_s20 }
   0xe   :  { %p443_p6 = por %p442_p5, %p441_p4 }
  0x10   :  { %p444_p7 = pnand %p443_p6, %p437_p3 }
  0x12   :  { %447 = shalt.err (!%p444_p7)
}
  0x13   :  { %40 = dma.hbm_to_vmem [thread:$0]  %s669_s2, 16, %s38_s10, [#allocation6]  }
  0x14   :  { %s448_s26 = scalar_lea.hbm %s668_s1, 128 }
  0x15   :  { %p449_p8 = scmp.ne.s32.totalorder %s668_s1, %s448_s26  ;;  %p452_p9 = scmp.lt.u32.totalorder %s448_s26, %s668_s1 }
  0x17   :  { %p454_p10 = pnand %p452_p9, %p449_p8 }
  0x19   :  { %457 = shalt.err (!%p454_p10)
}
  0x1a   :  { %s458_s11 = scalar_lea.vmem %s578_s12, 128  ;;  %p463_p12 = scmp.lt.s32.totalorder %s578_s12, %s578_s12 }
  0x1b   :  { %p459_p11 = scmp.ne.s32.totalorder %s578_s12, %s458_s11  ;;  %p464_p13 = scmp.lt.s32.totalorder %s458_s11, %s458_s11 }
  0x1d   :  { %p465_p0 = por %p464_p13, %p463_p12 }
  0x1f   :  { %p466_p1 = pnand %p465_p0, %p459_p11 }
  0x21   :  { %469 = shalt.err (!%p466_p1)
}
  0x22   :  { %s522_s2 = smov 64   ;;  %s523_s10 = smov 4  }
  0x23   :  { %30 = dma.hbm_to_vmem [thread:$0]  %s668_s1, 128, %s578_s12, [#allocation3], %s522_s2, %s522_s2, %s523_s10  }
  0x24   :  { %s524_s15 = smov [#allocation7]   ;;  %s470_s19 = scalar_lea.hbm %s671_s4, 16 }
  0x25   :  { %s49_s16 = sshll.u32 %s524_s15, 4  ;;  %p471_p2 = scmp.ne.s32.totalorder %s671_s4, %s470_s19  ;;  %s50_s16 = int_to_ptr.vmem [resolvable:$true] %s49_s16 }
  0x26   :  { %p474_p3 = scmp.lt.u32.totalorder %s470_s19, %s671_s4 }
  0x28   :  { %p476_p4 = pnand %p474_p3, %p471_p2 }
  0x2a   :  { %479 = shalt.err (!%p476_p4)
}
  0x2b   :  { %s480_s24 = scalar_lea.vmem %s50_s16, 16  ;;  %s484_s1 = scalar_lea.vmem %s50_s16, 32 }
  0x2c   :  { %p481_p5 = scmp.ne.s32.totalorder %s50_s16, %s480_s24  ;;  %p485_p6 = scmp.lt.s32.totalorder %s50_s16, %s50_s16 }
  0x2d   :  { %p486_p7 = scmp.lt.s32.totalorder %s484_s1, %s480_s24 }
  0x2f   :  { %p487_p8 = por %p486_p7, %p485_p6 }
  0x31   :  { %p488_p9 = pnand %p487_p8, %p481_p5 }
  0x33   :  { %491 = shalt.err (!%p488_p9)
}
  0x34   :  { %52 = dma.hbm_to_vmem [thread:$0]  %s671_s4, 16, %s50_s16, [#allocation6]  }
  0x35   :  { %514 = dma.done.wait [#allocation3], 128  }
  0x36   :  { %515 = vsyncadd [#allocation3], 4294967168 }
  0x37   :  { %516 = dma.done.wait [#allocation6], 32  }
  0x38   :  { %517 = vsyncadd [#allocation6], 4294967264  ;;  %v525_v0 = vmov 0.0   ;;  %vm526_vm0 = vmmov 0   ;;  %v419_v1 = vld [vmem:[#allocation2] sm:$0xff]   ;;  %vm88_vm1 = vcmask 130048  }
  0x39   :  { %381 = vmatprep.subr.bf16.mxu0 %v525_v0  ;;  %383 = vmatprep.mubr.msk.bf16.mxu0 %vm526_vm0, %v525_v0  ;;  %v71_v2 = vld [vmem:[%s667_s0] sm:$0x3]  ;;  %v421_v5 = vld [vmem:[%s670_s3 + $0x8] sm:$0xff]   ;;  %vm157_vm2 = vcmask 261120   ;;  %s527_s19 = smov [#allocation8]   ;;  %vm337_vm3 = vcmask 58368  }
  0x3a   :  { %387 = vmatprep.subr.bf16.mxu1 %v525_v0  ;;  %391 = vmatprep.mubr.msk.bf16.mxu1 %vm526_vm0, %v525_v0  ;;  %v75_v3 = vpack.c.bf16 %v71_v2, %v71_v2  ;;  %v420_v4 = vld [vmem:[%s670_s3] sm:$0xff]   ;;  %v355_v7 = vld [vmem:[#allocation5] ss:$0 sm:$0xff]  ;;  %v358_v17 = vld [vmem:[#allocation7] ss:$0 sm:$0xff] }
  0x3b   :  { %382 = vmatpush3.bf16.msra.mxu0 %v419_v1  ;;  %388 = vmatpush3.bf16.msra.mxu1 %v420_v4  ;;  %v422_v6 = vld [vmem:[%s672_s5] sm:$0xff]   ;;  %v423_v15 = vld [vmem:[%s672_s5 + $0x8] sm:$0xff]  }
  0x3c   :  { %395 = vmatprep.subr.bf16.mxu0 %v525_v0  ;;  %389 = vmatprep.subr.bf16.mxu1 %v525_v0  ;;  %v424_v16 = vld [vmem:[%s674_s7] sm:$0xff]   ;;  %v425_v25 = vld [vmem:[%s674_s7 + $0x8] sm:$0xff]   ;;  %s345_s7 = sshll.u32 %s527_s19, 4  ;;  %s346_s7 = int_to_ptr.vmem [resolvable:$true] %s345_s7 }
  0x3d   :  { %v362_v26 = vld [vmem:[%s673_s6] ss:$0 sm:$0xff]  ;;  %s492_s6 = scalar_lea.vmem %s346_s7, 32  ;;  %p497_p11 = scmp.lt.s32.totalorder %s346_s7, %s346_s7 }
  0x3e   :  { %384 = vmatmul.mubr.msk.bf16.vlgmr.msra.gmra.mrb[0].mxu0 %vm88_vm1, %v75_v3  ;;  %v366_v34 = vld [vmem:[%s675_s8] ss:$0 sm:$0xff]  ;;  %p493_p10 = scmp.ne.s32.totalorder %s346_s7, %s492_s6  ;;  %p498_p12 = scmp.lt.s32.totalorder %s492_s6, %s492_s6 }
  0x3f   :  { %399 = vmatprep.mubr.msk.bf16.mxu0 %vm526_vm0, %v525_v0  ;;  %390 = vmatpush3.bf16.msra.mxu1 %v421_v5 }
  0x40   :  { %403 = vmatprep.subr.bf16.mxu1 %v525_v0  ;;  %396 = vmatpush3.bf16.msra.mxu0 %v422_v6  ;;  %p499_p13 = por %p498_p12, %p497_p11 }
  0x41   :  { %397 = vmatprep.subr.bf16.mxu0 %v525_v0 }
  0x42   :  { %p500_p0 = pnand %p499_p13, %p493_p10 }
  0x44   :  { %398 = vmatpush3.bf16.msra.mxu0 %v423_v15 }
 0x111   :  { %v126_v8 = vpop.f32.mrb[0].mxu0 }
 0x112   :  { %v127_v9 = vadd.f32 %v355_v7, %v126_v8  ;;  %v385_v10 = vpop.f32.mrb[1].mxu0 }
 0x113   :  { %v129_v11 = vpop.f32.mrb[2].mxu0 }
 0x114   :  { %v132_v12 = vmax.f32 %v127_v9, 0.0  ;;  %v386_v13 = vpop.f32.mrb[3].mxu0 }
 0x116   :  { %v138_v14 = vpack.c.bf16 %v132_v12, %v132_v12 }
 0x118   :  { %392 = vmatmul.mubr.msk.bf16.vlgmr.msra.gmra.mrb[0].mxu1 %vm157_vm2, %v138_v14 }
 0x119   :  { %407 = vmatprep.mubr.msk.bf16.mxu1 %vm526_vm0, %v525_v0  ;;  %404 = vmatpush3.bf16.msra.mxu1 %v424_v16 }
 0x11a   :  { %405 = vmatprep.subr.bf16.mxu1 %v525_v0 }
 0x11d   :  { %406 = vmatpush3.bf16.msra.mxu1 %v425_v25 }
 0x1eb   :  { %v195_v18 = vpop.f32.mrb[0].mxu1 }
 0x1ec   :  { %v196_v19 = vadd.f32 %v358_v17, %v195_v18  ;;  %v393_v20 = vpop.f32.mrb[1].mxu1 }
 0x1ed   :  { %v198_v21 = vpop.f32.mrb[2].mxu1 }
 0x1ee   :  { %v201_v22 = vmax.f32 %v196_v19, 0.0  ;;  %v394_v23 = vpop.f32.mrb[3].mxu1 }
 0x1f0   :  { %v207_v24 = vpack.c.bf16 %v201_v22, %v201_v22 }
 0x1f2   :  { %400 = vmatmul.mubr.msk.bf16.vlgmr.msra.gmra.mrb[4].mxu0 %vm157_vm2, %v207_v24 }
 0x2c5   :  { %v263_v27 = vpop.f32.mrb[4].mxu0 }
 0x2c6   :  { %v264_v28 = vadd.f32 %v362_v26, %v263_v27  ;;  %v401_v29 = vpop.f32.mrb[5].mxu0 }
 0x2c7   :  { %v266_v30 = vpop.f32.mrb[6].mxu0 }
 0x2c8   :  { %v269_v31 = vmax.f32 %v264_v28, 0.0  ;;  %v402_v32 = vpop.f32.mrb[7].mxu0 }
 0x2ca   :  { %v275_v33 = vpack.c.bf16 %v269_v31, %v269_v31 }
 0x2cc   :  { %408 = vmatmul.mubr.msk.bf16.vlgmr.msra.gmra.mrb[4].mxu1 %vm157_vm2, %v275_v33 }
 0x39f   :  { %v331_v35 = vpop.f32.mrb[4].mxu1 }
 0x3a0   :  { %v332_v36 = vadd.f32 %v366_v34, %v331_v35  ;;  %v409_v37 = vpop.f32.mrb[5].mxu1 }
 0x3a1   :  { %v334_v38 = vpop.f32.mrb[6].mxu1 }
 0x3a2   :  { %v410_v39 = vpop.f32.mrb[7].mxu1  ;;  %338 = vst.msk [vmem:[#allocation8] sm:$0x3] %vm337_vm3, %v332_v36 }
 0x3a3   :  { %503 = shalt.err (!%p500_p0)
}
 0x3a4   :  { %s504_s8 = scalar_lea.hbm %s676_s9, 32 }
 0x3a5   :  { %p505_p1 = scmp.ne.s32.totalorder %s676_s9, %s504_s8  ;;  %p508_p2 = scmp.lt.u32.totalorder %s504_s8, %s676_s9 }
 0x3a7   :  { %p510_p3 = pnand %p508_p2, %p505_p1 }
 0x3a9   :  { %513 = shalt.err (!%p510_p3)
}
 0x3aa   :  { %348 = dma.vmem_to_hbm [thread:$0]  %s346_s7, 32, %s676_s9, [#allocation4]  }
 0x3ab   :  { %518 = dma.done.wait [#allocation4], 32  }
 0x3ac   :  { %519 = vsyncadd [#allocation4], 4294967264 }
 0x3ad   :  { %352 = vsyncpa [#allocation3], 1 }
 0x3ae   :  { %353 = vsyncpa [#allocation6], 1 }
 0x3af   :  { %354 = vsyncpa [#allocation4], 1 }

</bundles_post_ra>
